<compile_context>
chip_gen: v5e
topology: v5e:2x2
jax: 0.10.0
libtpu: 0.0.40
codegen_flags: <defaults>
</compile_context>

<pallas_src>
import functools

import jax
import jax.numpy as jnp
from jax import lax
from jax.experimental import pallas as pl
from jax.experimental.pallas import tpu as pltpu

BN_EPS = 1e-5


# ----------------------------------------------------------------------------
# Fused kernel: GCNConv -> ReLU -> BN -> GCNConv -> ReLU -> BN -> global_max_pool
# ----------------------------------------------------------------------------
def gcnnet_kernel(a_ref, x_ref, ib_ref,
                  w1_ref, b1_ref, g1_ref, be1_ref,
                  w2_ref, b2_ref, g2_ref, be2_ref,
                  o_ref, *, num_graphs):
    a = a_ref[...]                                    # (N, N) binary adjacency, bf16 (exact)
    n = a.shape[0]
    inv_n = 1.0 / n
    ones_col = jnp.ones((n, 1), jnp.bfloat16)
    ones_row = jnp.ones((1, n), jnp.float32)

    # deg = rowsum(A + I) computed on the (otherwise idle) MXU; exact since A is 0/1
    # and accumulation is f32.
    deg = jnp.dot(a, ones_col, preferred_element_type=jnp.float32) + 1.0   # (N, 1)
    d = lax.rsqrt(deg)                                                     # (N, 1)

    def a_hat_matmul(y):                              # A_hat @ y, y f32
        ys = d * y
        ay = jnp.dot(a, ys.astype(jnp.bfloat16), preferred_element_type=jnp.float32)
        return d * (ay + ys)

    def relu_bn(h, gamma, beta):
        h = jnp.maximum(h, 0.0)                       # ReLU (f32 VPU)
        # Training-mode BatchNorm1d over the node axis.  Two-pass centered variance
        # (avoids E[h^2]-mean^2 cancellation); both column sums run as f32 MXU
        # matmuls instead of XLU reductions.
        mean = jnp.dot(ones_row, h, preferred_element_type=jnp.float32) * inv_n
        c = h - mean
        var = jnp.dot(ones_row, c * c, preferred_element_type=jnp.float32) * inv_n
        return c * (gamma * lax.rsqrt(var + BN_EPS)) + beta

    # ---- layer 1: (A_hat @ X) @ W1 + b1.
    # (Reassociation kept only for the small (N, Cin) intermediate; at 16/32/128-wide
    # channels every matmul pads to one MXU tile, so the kernel is HBM/overhead-bound,
    # not MXU-bound.)
    ax = a_hat_matmul(x_ref[...])                                               # (N, Cin)
    h1 = jnp.dot(ax.astype(jnp.bfloat16), w1_ref[...],
                 preferred_element_type=jnp.float32) + b1_ref[...]
    h1 = relu_bn(h1, g1_ref[...], be1_ref[...])                                 # (N, 128)

    # ---- layer 2: A_hat @ (h1 @ W2) + b2
    hw = jnp.dot(h1.astype(jnp.bfloat16), w2_ref[...],
                 preferred_element_type=jnp.float32)                            # (N, Cout)
    h2 = relu_bn(a_hat_matmul(hw) + b2_ref[...], g2_ref[...], be2_ref[...])

    # ---- global_max_pool: per-graph direct row stores (no concatenate/relayout).
    # Note: a graph id with zero assigned nodes pools to -inf for that row.
    # TODO(synk): for large num_graphs replace the static unroll with a fori_loop or
    # a segment-id based reduction.
    ib = ib_ref[...]                                  # (N, 1) int32
    for g in range(num_graphs):                       # static, tiny G
        masked = jnp.where(ib == g, h2, -jnp.inf)     # (N, Cout)
        o_ref[g:g + 1, :] = jnp.max(masked, axis=0, keepdims=True).astype(o_ref.dtype)


# ----------------------------------------------------------------------------
# Wrapper: one pallas_call for the whole forward
# ----------------------------------------------------------------------------
def _vmem_limit_bytes(n, cin, hidden, cout, num_graphs):
    """Scoped-VMEM request sized to the actual resident set (+headroom)."""
    resident = (
        2 * n * n                          # A (bf16)
        + 4 * n * cin                      # X
        + 4 * n                            # ibatch
        + 2 * (cin * hidden + hidden * cout)   # W1, W2 (bf16)
        + 4 * 3 * (hidden + cout)          # biases / gamma / beta
        + 4 * num_graphs * cout            # output
        + 4 * (2 * n * hidden + 3 * n * cout + n * cin)   # h1/h2/ax/hw temporaries
    )
    # ~2x for bf16 operand copies + compiler temporaries, 4 MiB fixed floor slack,
    # 16 MiB minimum; cap at 64 MiB so the request is valid on v7x as well.
    return int(min(max(2 * resident + (4 << 20), 16 << 20), 64 << 20))


def gcnnet_forward(params, input_feature, adj, ibatch, num_graphs):
    n, cin = input_feature.shape
    hidden = params["w1"].shape[1]
    out_ch = params["w2"].shape[1]

    ib2 = ibatch.reshape(n, 1).astype(jnp.int32)
    row = lambda v: v.reshape(1, -1).astype(jnp.float32)

    args = (
        adj.astype(jnp.bfloat16),               # (N, N) raw binary adjacency (exact in bf16)
        input_feature.astype(jnp.float32),      # (N, Cin)
        ib2,                                    # (N, 1) graph assignment
        params["w1"].astype(jnp.bfloat16), row(params["b1"]),
        row(params["gamma1"]), row(params["beta1"]),
        params["w2"].astype(jnp.bfloat16), row(params["b2"]),
        row(params["gamma2"]), row(params["beta2"]),
    )

    vmem_spec = lambda a: pl.BlockSpec(a.shape, memory_space=pltpu.MemorySpace.VMEM)
    kernel = functools.partial(gcnnet_kernel, num_graphs=num_graphs)
    return pl.pallas_call(
        kernel,
        out_shape=jax.ShapeDtypeStruct((num_graphs, out_ch), jnp.float32),
        in_specs=[vmem_spec(a) for a in args],            # whole-array VMEM blocks
        out_specs=pl.BlockSpec((num_graphs, out_ch),
                               memory_space=pltpu.MemorySpace.VMEM),
        compiler_params=pltpu.CompilerParams(
            vmem_limit_bytes=_vmem_limit_bytes(n, cin, hidden, out_ch, num_graphs)),
    )(*args)


def xavier_uniform(key, shape):
    fan_in, fan_out = shape
    bound = jnp.sqrt(6.0 / (fan_in + fan_out))
    return jax.random.uniform(key, shape, jnp.float32, -bound, bound)


if __name__ == "__main__":
    # Small shapes consistent with the module.
    N = 64            # number of nodes (across all graphs in the batch)
    IN_CH = 16        # in_channels
    HIDDEN = 128      # GCNConv(in, 128)
    OUT_CH = 32       # out_channels
    NUM_GRAPHS = 2

    key = jax.random.PRNGKey(0)
    k_x, k_a, k_w1, k_w2 = jax.random.split(key, 4)

    # Inputs
    input_feature = jax.random.normal(k_x, (N, IN_CH), jnp.float32)
    # random symmetric binary adjacency (no self loops; GCNConv adds them)
    a_rand = jax.random.uniform(k_a, (N, N))
    adj = (a_rand > 0.9).astype(jnp.float32)
    adj = jnp.maximum(adj, adj.T)
    adj = adj * (1.0 - jnp.eye(N, dtype=jnp.float32))
    # batch assignment: first 40 nodes -> graph 0, remaining 24 -> graph 1
    ibatch = jnp.concatenate([jnp.zeros((40,), jnp.int32), jnp.ones((24,), jnp.int32)])

    # Deterministic parameters (xavier-uniform weights, zero biases,
    # BatchNorm gamma=1 / beta=0 as in a freshly constructed module).
    params = {
        "w1": xavier_uniform(k_w1, (IN_CH, HIDDEN)),
        "b1": jnp.zeros((HIDDEN,), jnp.float32),
        "gamma1": jnp.ones((HIDDEN,), jnp.float32),
        "beta1": jnp.zeros((HIDDEN,), jnp.float32),
        "w2": xavier_uniform(k_w2, (HIDDEN, OUT_CH)),
        "b2": jnp.zeros((OUT_CH,), jnp.float32),
        "gamma2": jnp.ones((OUT_CH,), jnp.float32),
        "beta2": jnp.zeros((OUT_CH,), jnp.float32),
    }

    out = gcnnet_forward(params, input_feature, adj, ibatch, NUM_GRAPHS)
    out = jax.block_until_ready(out)
    assert out.shape == (NUM_GRAPHS, OUT_CH)
    assert bool(jnp.all(jnp.isfinite(out)))
    print("KERNEL_OK")
</pallas_src>

<mosaic_0001>
module attributes {stable_mosaic.version = 11 : i64} {
  func.func @gcnnet_kernel(%arg0: memref<64x64xbf16, #tpu.memory_space<vmem>>, %arg1: memref<64x16xf32, #tpu.memory_space<vmem>>, %arg2: memref<64x1xi32, #tpu.memory_space<vmem>>, %arg3: memref<16x128xbf16, #tpu.memory_space<vmem>>, %arg4: memref<1x128xf32, #tpu.memory_space<vmem>>, %arg5: memref<1x128xf32, #tpu.memory_space<vmem>>, %arg6: memref<1x128xf32, #tpu.memory_space<vmem>>, %arg7: memref<128x32xbf16, #tpu.memory_space<vmem>>, %arg8: memref<1x32xf32, #tpu.memory_space<vmem>>, %arg9: memref<1x32xf32, #tpu.memory_space<vmem>>, %arg10: memref<1x32xf32, #tpu.memory_space<vmem>>, %arg11: memref<2x32xf32, #tpu.memory_space<vmem>>) attributes {dimension_semantics = [], scalar_prefetch = 0 : i64, scratch_operands = 0 : i64, tpu.core_type = #tpu.core_type<tc>} {
    %c0 = arith.constant 0 : index
    %c0_0 = arith.constant 0 : index
    %0 = vector.load %arg0[%c0, %c0_0] : memref<64x64xbf16, #tpu.memory_space<vmem>>, vector<64x64xbf16>
    %cst = arith.constant 1.000000e+00 : bf16
    %1 = vector.broadcast %cst : bf16 to vector<64x1xbf16>
    %cst_1 = arith.constant 1.000000e+00 : f32
    %2 = vector.broadcast %cst_1 : f32 to vector<1x64xf32>
    %cst_2 = arith.constant dense<0.000000e+00> : vector<64x1xf32>
    %3 = tpu.matmul %0, %1, %cst_2 {dimension_numbers = #tpu.dot_dimension_numbers<[1], [0], [0], [1], [0, 0, 1, 1], [], []>} : vector<64x64xbf16>, vector<64x1xbf16>, vector<64x1xf32> -> vector<64x1xf32>
    %cst_3 = arith.constant 1.000000e+00 : f32
    %4 = vector.broadcast %cst_3 : f32 to vector<64x1xf32>
    %5 = arith.addf %3, %4 : vector<64x1xf32>
    %6 = math.rsqrt %5 : vector<64x1xf32>
    %c0_4 = arith.constant 0 : index
    %c0_5 = arith.constant 0 : index
    %7 = vector.load %arg1[%c0_4, %c0_5] : memref<64x16xf32, #tpu.memory_space<vmem>>, vector<64x16xf32>
    %8 = vector.broadcast %6 : vector<64x1xf32> to vector<64x16xf32>
    %9 = arith.mulf %8, %7 : vector<64x16xf32>
    %10 = arith.truncf %9 : vector<64x16xf32> to vector<64x16xbf16>
    %cst_6 = arith.constant dense<0.000000e+00> : vector<64x16xf32>
    %11 = tpu.matmul %0, %10, %cst_6 {dimension_numbers = #tpu.dot_dimension_numbers<[1], [0], [0], [1], [0, 0, 1, 1], [], []>} : vector<64x64xbf16>, vector<64x16xbf16>, vector<64x16xf32> -> vector<64x16xf32>
    %12 = arith.addf %11, %9 : vector<64x16xf32>
    %13 = vector.broadcast %6 : vector<64x1xf32> to vector<64x16xf32>
    %14 = arith.mulf %13, %12 : vector<64x16xf32>
    %15 = arith.truncf %14 : vector<64x16xf32> to vector<64x16xbf16>
    %c0_7 = arith.constant 0 : index
    %c0_8 = arith.constant 0 : index
    %16 = vector.load %arg3[%c0_7, %c0_8] : memref<16x128xbf16, #tpu.memory_space<vmem>>, vector<16x128xbf16>
    %cst_9 = arith.constant dense<0.000000e+00> : vector<64x128xf32>
    %17 = tpu.matmul %15, %16, %cst_9 {dimension_numbers = #tpu.dot_dimension_numbers<[1], [0], [0], [1], [0, 0, 1, 1], [], []>} : vector<64x16xbf16>, vector<16x128xbf16>, vector<64x128xf32> -> vector<64x128xf32>
    %c0_10 = arith.constant 0 : index
    %c0_11 = arith.constant 0 : index
    %18 = vector.load %arg4[%c0_10, %c0_11] : memref<1x128xf32, #tpu.memory_space<vmem>>, vector<1x128xf32>
    %19 = vector.broadcast %18 : vector<1x128xf32> to vector<64x128xf32>
    %20 = arith.addf %17, %19 : vector<64x128xf32>
    %c0_12 = arith.constant 0 : index
    %c0_13 = arith.constant 0 : index
    %21 = vector.load %arg5[%c0_12, %c0_13] : memref<1x128xf32, #tpu.memory_space<vmem>>, vector<1x128xf32>
    %c0_14 = arith.constant 0 : index
    %c0_15 = arith.constant 0 : index
    %22 = vector.load %arg6[%c0_14, %c0_15] : memref<1x128xf32, #tpu.memory_space<vmem>>, vector<1x128xf32>
    %cst_16 = arith.constant 0.000000e+00 : f32
    %23 = vector.broadcast %cst_16 : f32 to vector<64x128xf32>
    %24 = arith.maximumf %20, %23 : vector<64x128xf32>
    %cst_17 = arith.constant dense<0.000000e+00> : vector<1x128xf32>
    %25 = tpu.matmul %2, %24, %cst_17 {dimension_numbers = #tpu.dot_dimension_numbers<[1], [0], [0], [1], [0, 0, 1, 1], [], []>} : vector<1x64xf32>, vector<64x128xf32>, vector<1x128xf32> -> vector<1x128xf32>
    %cst_18 = arith.constant 1.562500e-02 : f32
    %26 = vector.broadcast %cst_18 : f32 to vector<1x128xf32>
    %27 = arith.mulf %25, %26 : vector<1x128xf32>
    %28 = vector.broadcast %27 : vector<1x128xf32> to vector<64x128xf32>
    %29 = arith.subf %24, %28 : vector<64x128xf32>
    %30 = arith.mulf %29, %29 : vector<64x128xf32>
    %cst_19 = arith.constant dense<0.000000e+00> : vector<1x128xf32>
    %31 = tpu.matmul %2, %30, %cst_19 {dimension_numbers = #tpu.dot_dimension_numbers<[1], [0], [0], [1], [0, 0, 1, 1], [], []>} : vector<1x64xf32>, vector<64x128xf32>, vector<1x128xf32> -> vector<1x128xf32>
    %cst_20 = arith.constant 1.562500e-02 : f32
    %32 = vector.broadcast %cst_20 : f32 to vector<1x128xf32>
    %33 = arith.mulf %31, %32 : vector<1x128xf32>
    %cst_21 = arith.constant 9.99999974E-6 : f32
    %34 = vector.broadcast %cst_21 : f32 to vector<1x128xf32>
    %35 = arith.addf %33, %34 : vector<1x128xf32>
    %36 = math.rsqrt %35 : vector<1x128xf32>
    %37 = arith.mulf %21, %36 : vector<1x128xf32>
    %38 = vector.broadcast %37 : vector<1x128xf32> to vector<64x128xf32>
    %39 = arith.mulf %29, %38 : vector<64x128xf32>
    %40 = vector.broadcast %22 : vector<1x128xf32> to vector<64x128xf32>
    %41 = arith.addf %39, %40 : vector<64x128xf32>
    %42 = arith.truncf %41 : vector<64x128xf32> to vector<64x128xbf16>
    %c0_22 = arith.constant 0 : index
    %c0_23 = arith.constant 0 : index
    %43 = vector.load %arg7[%c0_22, %c0_23] : memref<128x32xbf16, #tpu.memory_space<vmem>>, vector<128x32xbf16>
    %cst_24 = arith.constant dense<0.000000e+00> : vector<64x32xf32>
    %44 = tpu.matmul %42, %43, %cst_24 {dimension_numbers = #tpu.dot_dimension_numbers<[1], [0], [0], [1], [0, 0, 1, 1], [], []>} : vector<64x128xbf16>, vector<128x32xbf16>, vector<64x32xf32> -> vector<64x32xf32>
    %45 = vector.broadcast %6 : vector<64x1xf32> to vector<64x32xf32>
    %46 = arith.mulf %45, %44 : vector<64x32xf32>
    %47 = arith.truncf %46 : vector<64x32xf32> to vector<64x32xbf16>
    %cst_25 = arith.constant dense<0.000000e+00> : vector<64x32xf32>
    %48 = tpu.matmul %0, %47, %cst_25 {dimension_numbers = #tpu.dot_dimension_numbers<[1], [0], [0], [1], [0, 0, 1, 1], [], []>} : vector<64x64xbf16>, vector<64x32xbf16>, vector<64x32xf32> -> vector<64x32xf32>
    %49 = arith.addf %48, %46 : vector<64x32xf32>
    %50 = vector.broadcast %6 : vector<64x1xf32> to vector<64x32xf32>
    %51 = arith.mulf %50, %49 : vector<64x32xf32>
    %c0_26 = arith.constant 0 : index
    %c0_27 = arith.constant 0 : index
    %52 = vector.load %arg8[%c0_26, %c0_27] : memref<1x32xf32, #tpu.memory_space<vmem>>, vector<1x32xf32>
    %53 = vector.broadcast %52 : vector<1x32xf32> to vector<64x32xf32>
    %54 = arith.addf %51, %53 : vector<64x32xf32>
    %c0_28 = arith.constant 0 : index
    %c0_29 = arith.constant 0 : index
    %55 = vector.load %arg9[%c0_28, %c0_29] : memref<1x32xf32, #tpu.memory_space<vmem>>, vector<1x32xf32>
    %c0_30 = arith.constant 0 : index
    %c0_31 = arith.constant 0 : index
    %56 = vector.load %arg10[%c0_30, %c0_31] : memref<1x32xf32, #tpu.memory_space<vmem>>, vector<1x32xf32>
    %cst_32 = arith.constant 0.000000e+00 : f32
    %57 = vector.broadcast %cst_32 : f32 to vector<64x32xf32>
    %58 = arith.maximumf %54, %57 : vector<64x32xf32>
    %cst_33 = arith.constant dense<0.000000e+00> : vector<1x32xf32>
    %59 = tpu.matmul %2, %58, %cst_33 {dimension_numbers = #tpu.dot_dimension_numbers<[1], [0], [0], [1], [0, 0, 1, 1], [], []>} : vector<1x64xf32>, vector<64x32xf32>, vector<1x32xf32> -> vector<1x32xf32>
    %cst_34 = arith.constant 1.562500e-02 : f32
    %60 = vector.broadcast %cst_34 : f32 to vector<1x32xf32>
    %61 = arith.mulf %59, %60 : vector<1x32xf32>
    %62 = vector.broadcast %61 : vector<1x32xf32> to vector<64x32xf32>
    %63 = arith.subf %58, %62 : vector<64x32xf32>
    %64 = arith.mulf %63, %63 : vector<64x32xf32>
    %cst_35 = arith.constant dense<0.000000e+00> : vector<1x32xf32>
    %65 = tpu.matmul %2, %64, %cst_35 {dimension_numbers = #tpu.dot_dimension_numbers<[1], [0], [0], [1], [0, 0, 1, 1], [], []>} : vector<1x64xf32>, vector<64x32xf32>, vector<1x32xf32> -> vector<1x32xf32>
    %cst_36 = arith.constant 1.562500e-02 : f32
    %66 = vector.broadcast %cst_36 : f32 to vector<1x32xf32>
    %67 = arith.mulf %65, %66 : vector<1x32xf32>
    %cst_37 = arith.constant 9.99999974E-6 : f32
    %68 = vector.broadcast %cst_37 : f32 to vector<1x32xf32>
    %69 = arith.addf %67, %68 : vector<1x32xf32>
    %70 = math.rsqrt %69 : vector<1x32xf32>
    %71 = arith.mulf %55, %70 : vector<1x32xf32>
    %72 = vector.broadcast %71 : vector<1x32xf32> to vector<64x32xf32>
    %73 = arith.mulf %63, %72 : vector<64x32xf32>
    %74 = vector.broadcast %56 : vector<1x32xf32> to vector<64x32xf32>
    %75 = arith.addf %73, %74 : vector<64x32xf32>
    %c0_38 = arith.constant 0 : index
    %c0_39 = arith.constant 0 : index
    %76 = vector.load %arg2[%c0_38, %c0_39] : memref<64x1xi32, #tpu.memory_space<vmem>>, vector<64x1xi32>
    %c0_i32 = arith.constant 0 : i32
    %77 = vector.broadcast %c0_i32 : i32 to vector<64x1xi32>
    %78 = arith.cmpi eq, %76, %77 : vector<64x1xi32>
    %cst_40 = arith.constant 0xFF800000 : f32
    %79 = vector.shape_cast %78 : vector<64x1xi1> to vector<64x1xi1>
    %80 = vector.broadcast %79 : vector<64x1xi1> to vector<64x32xi1>
    %81 = vector.broadcast %cst_40 : f32 to vector<64x32xf32>
    %82 = arith.select %80, %75, %81 : vector<64x32xi1>, vector<64x32xf32>
    %cst_41 = arith.constant dense<0xFF800000> : vector<32xf32>
    %83 = vector.multi_reduction <maximumf>, %82, %cst_41 [0] : vector<64x32xf32> to vector<32xf32>
    %84 = vector.shape_cast %83 : vector<32xf32> to vector<1x32xf32>
    %c0_42 = arith.constant 0 : index
    %c0_43 = arith.constant 0 : index
    %85 = vector.load %arg11[%c0_42, %c0_43] : memref<2x32xf32, #tpu.memory_space<vmem>>, vector<1x32xf32>
    tpu.vector_store %arg11[%c0_42, %c0_43], %84 {strides = array<i32>} : memref<2x32xf32, #tpu.memory_space<vmem>>, vector<1x32xf32>,
    %c1_i32 = arith.constant 1 : i32
    %86 = vector.broadcast %c1_i32 : i32 to vector<64x1xi32>
    %87 = arith.cmpi eq, %76, %86 : vector<64x1xi32>
    %cst_44 = arith.constant 0xFF800000 : f32
    %88 = vector.shape_cast %87 : vector<64x1xi1> to vector<64x1xi1>
    %89 = vector.broadcast %88 : vector<64x1xi1> to vector<64x32xi1>
    %90 = vector.broadcast %cst_44 : f32 to vector<64x32xf32>
    %91 = arith.select %89, %75, %90 : vector<64x32xi1>, vector<64x32xf32>
    %cst_45 = arith.constant dense<0xFF800000> : vector<32xf32>
    %92 = vector.multi_reduction <maximumf>, %91, %cst_45 [0] : vector<64x32xf32> to vector<32xf32>
    %93 = vector.shape_cast %92 : vector<32xf32> to vector<1x32xf32>
    %c1 = arith.constant 1 : index
    %c0_46 = arith.constant 0 : index
    %94 = vector.load %arg11[%c1, %c0_46] : memref<2x32xf32, #tpu.memory_space<vmem>>, vector<1x32xf32>
    tpu.vector_store %arg11[%c1, %c0_46], %93 {strides = array<i32>} : memref<2x32xf32, #tpu.memory_space<vmem>>, vector<1x32xf32>,
    return
  }
}

</mosaic_0001>

<bundles_post_ra>
// kernel: tpu_custom_call.1
= control target key start
LH: loop header
LB: loop body
LE: loop exit
PB: predicated region body
PF: predicated region fallthrough
CT: control target
= control target key end

     0   :  { %v1038_v0 = vmov 1065369472   ;;  %s1479_s0 = inlined_call_operand.vmem [shape: bf16[64,64], index: 0, kind: input, shape index: {}]   ;;  %s1480_s1 = inlined_call_operand.vmem [shape: f32[64,16], index: 1, kind: input, shape index: {}]   ;;  %s1481_s2 = inlined_call_operand.vmem [shape: s32[64,1], index: 2, kind: input, shape index: {}]   ;;  %s1482_s3 = inlined_call_operand.vmem [shape: bf16[16,128], index: 3, kind: input, shape index: {}]   ;;  %s1483_s4 = inlined_call_operand.vmem [shape: f32[1,128], index: 4, kind: input, shape index: {}]   ;;  %s1484_s5 = inlined_call_operand.vmem [shape: f32[1,128], index: 5, kind: input, shape index: {}]   ;;  %s1485_s6 = inlined_call_operand.vmem [shape: f32[1,128], index: 6, kind: input, shape index: {}]   ;;  %s1486_s7 = inlined_call_operand.vmem [shape: bf16[128,32], index: 7, kind: input, shape index: {}]   ;;  %s1487_s8 = inlined_call_operand.vmem [shape: f32[1,32], index: 8, kind: input, shape index: {}]   ;;  %s1488_s9 = inlined_call_operand.vmem [shape: f32[1,32], index: 9, kind: input, shape index: {}]   ;;  %s1489_s10 = inlined_call_operand.vmem [shape: f32[1,32], index: 10, kind: input, shape index: {}]   ;;  %s1490_s11 = inlined_call_operand.hbm [shape: f32[2,32], index: 11, kind: output, shape index: {}]  }
   0x1   :  { %86 = vmatpush.bf16.msra.mxu0 %v1038_v0 }
   0x2   :  { %16 = vsyncpa [#allocation3], 0  ;;  %v1105_v1 = vld [vmem:[%s1479_s0] sm:$0xff]  ;;  %vm69_vm0 = vcmask 523264   ;;  %v1112_v2 = vld [vmem:[%s1479_s0 + $0x8] sm:$0xff]  ;;  %v1039_v6 = vmov 0  }
   0x3   :  { %v1119_v3 = vld [vmem:[%s1479_s0 + $0x10] sm:$0xff]  ;;  %v1126_v4 = vld [vmem:[%s1479_s0 + $0x18] sm:$0xff]  ;;  %987 = vset.pattern.permute.xlu2 %v1039_v6  ;;  %986 = vset.pattern.permute.xlu1 %v1039_v6  ;;  %v1139_v34 = vld [vmem:[%s1481_s2] sm:$0xff] }
   0x4   :  { %985 = vset.pattern.permute.xlu0 %v1039_v6  ;;  %vm721_vm7 = vcmp.eq.s32.totalorder %v1139_v34, 0  ;;  %v1153_v49 = vld [vmem:[%s1481_s2 + $0x18] sm:$0xff]  ;;  %v1161_v63 = vld [vmem:[%s1481_s2 + $0x30] sm:$0xff] }
   0x5   :  { %87 = vmatpush.bf16.msra.mxu0 %v1038_v0  ;;  %v729_v45 = vsel %vm721_vm7, 1, %v1039_v6  ;;  %vm724_vm11 = vcmp.eq.s32.totalorder %v1153_v49, 0 }
   0x6   :  { %v732_v58 = vsel %vm724_vm11, 1, %v1039_v6 }
   0x9   :  { %88 = vmatpush.bf16.msra.mxu0 %v1038_v0 }
   0xd   :  { %89 = vmatpush.bf16.msra.mxu0 %v1038_v0 }
  0x10   :  { %911 = vmatmul.msk.bf16.vlgmr.msra.gmra.mxu0 %vm69_vm0, %v1105_v1 }
  0x20   :  { %912 = vmatmul.msk.bf16.gmra.mxu0 %vm69_vm0, %v1112_v2 }
  0x30   :  { %913 = vmatmul.msk.bf16.gmra.mxu0 %vm69_vm0, %v1119_v3 }
  0x40   :  { %914 = vmatmul.msk.bf16.gmra.mxu0 %vm69_vm0, %v1126_v4 }
  0x8d   :  { %v91_v5 = vpop.f32.mrf.mxu0 }
  0x8e   :  { %v1146_v41 = vadd.f32 1.0, %v91_v5 }
  0x95   :  { %v93_v7 = vpop.f32.mrf.mxu0 }
  0x96   :  { %v1133_v22 = vadd.f32 1.0, %v93_v7 }
  0x9d   :  { %v96_v8 = vpop.f32.mrf.mxu0 }
  0x9e   :  { %v97_v9 = vadd.f32 1.0, %v96_v8 }
  0xa0   :  { %992 = vrsqrt.f32 %v97_v9  ;;  %vm137_vm2 = vweird.f32 %v97_v9 }
  0xa5   :  { %v98_v10 = vpop.f32.mrf.mxu0 }
  0xa6   :  { %v993_v11 = vpop.eup %992  ;;  %v99_v12 = vadd.f32 1.0, %v98_v10 }
  0xa7   :  { %v132_v13 = vmul.f32 %v993_v11, %v97_v9  ;;  %vm138_vm1 = vweird.f32 %v993_v11 }
  0xa8   :  { %994 = vrsqrt.f32 %v99_v12  ;;  %vm139_vm3 = vmor %vm137_vm2, %vm138_vm1  ;;  %vm147_vm5 = vweird.f32 %v99_v12  ;;  %vm727_vm2 = vcmp.eq.s32.totalorder %v1161_v63, 0 }
  0xa9   :  { %v133_v14 = vmul.f32 %v993_v11, %v132_v13 }
  0xab   :  { %v134_v15 = vmul.f32 0.5, %v133_v14 }
  0xad   :  { %v101_v16 = vpop.f32.mrf.mxu0  ;;  %v135_v17 = vsub.f32 1.5, %v134_v15 }
  0xae   :  { %v995_v18 = vpop.eup %994  ;;  %v102_v19 = vadd.f32 1.0, %v101_v16 }
  0xaf   :  { %v142_v20 = vmul.f32 %v995_v18, %v99_v12  ;;  %v136_v21 = vmul.f32 %v993_v11, %v135_v17  ;;  %vm148_vm4 = vweird.f32 %v995_v18  ;;  %v735_v12 = vsel %vm727_vm2, 1, %v1039_v6  ;;  %v715_v17 = vld [vmem:[%s1481_s2 + $0x10] sm:$0xff] }
  0xb0   :  { %996 = vrsqrt.f32 %v102_v19  ;;  %vm149_vm6 = vmor %vm147_vm5, %vm148_vm4  ;;  %vm157_vm9 = vweird.f32 %v102_v19  ;;  %vm723_vm7 = vcmp.eq.s32.totalorder %v715_v17, 0  ;;  %vm801_vm2 = vcmp.eq.s32.totalorder %v1139_v34, 1 }
  0xb1   :  { %v143_v23 = vmul.f32 %v995_v18, %v142_v20  ;;  %v140_v24 = vsel %vm139_vm3, %v993_v11, %v136_v21  ;;  %998 = vrsqrt.f32 %v1133_v22  ;;  %vm127_vm3 = vweird.f32 %v1133_v22 }
  0xb2   :  { %211 = vperm.xlu2 %987, %v140_v24  }
  0xb3   :  { %v144_v25 = vmul.f32 0.5, %v143_v23  ;;  %v731_v23 = vsel %vm723_vm7, 1, %v1039_v6  ;;  %vm807_vm7 = vcmp.eq.s32.totalorder %v1161_v63, 1 }
  0xb4   :  { %v815_v34 = vsel %vm807_vm7, 1, %v1039_v6 }
  0xb5   :  { %v145_v26 = vsub.f32 1.5, %v144_v25  ;;  %v103_v27 = vpop.f32.mrf.mxu0 }
  0xb6   :  { %v997_v28 = vpop.eup %996  ;;  %v104_v29 = vadd.f32 1.0, %v103_v27  ;;  %v718_v27 = vld [vmem:[%s1481_s2 + $0x28] sm:$0xff] }
  0xb7   :  { %v152_v30 = vmul.f32 %v997_v28, %v102_v19  ;;  %v146_v31 = vmul.f32 %v995_v18, %v145_v26  ;;  %v1141_v35 = vpop.eup %998  ;;  %vm158_vm8 = vweird.f32 %v997_v28 }
  0xb8   :  { %1000 = vrsqrt.f32 %v104_v29  ;;  %v122_v37 = vmul.f32 %v1141_v35, %v1133_v22  ;;  %vm159_vm10 = vmor %vm157_vm9, %vm158_vm8  ;;  %vm167_vm13 = vweird.f32 %v104_v29  ;;  %vm128_vm15 = vweird.f32 %v1141_v35 }
  0xb9   :  { %v153_v32 = vmul.f32 %v997_v28, %v152_v30  ;;  %v150_v33 = vsel %vm149_vm6, %v995_v18, %v146_v31  ;;  %vm129_vm5 = vmor %vm127_vm3, %vm128_vm15  ;;  %v714_v18 = vld [vmem:[%s1481_s2 + $0x8] sm:$0xff]  ;;  %vm117_vm15 = vweird.f32 %v1146_v41 }
  0xba   :  { %216 = vperm.xlu2 %987, %v150_v33   ;;  %v123_v46 = vmul.f32 %v1141_v35, %v122_v37  ;;  %vm802_vm9 = vcmp.eq.s32.totalorder %v714_v18, 1  ;;  %v720_v33 = vld [vmem:[%s1481_s2 + $0x38] sm:$0xff]  ;;  %vm722_vm3 = vcmp.eq.s32.totalorder %v714_v18, 0 }
  0xbb   :  { %v154_v36 = vmul.f32 0.5, %v153_v32  ;;  %v810_v24 = vsel %vm802_vm9, 1, %v1039_v6  ;;  %vm803_vm9 = vcmp.eq.s32.totalorder %v715_v17, 1 }
  0xbc   :  { %v124_v51 = vmul.f32 0.5, %v123_v46  ;;  %v197_v46 = vld [vmem:[%s1480_s1 + $0x30] sm:$0xff] }
  0xbd   :  { %v106_v38 = vpop.f32.mrf.mxu0  ;;  %v155_v39 = vsub.f32 1.5, %v154_v36  ;;  %v730_v36 = vsel %vm722_vm3, 1, %v1039_v6 }
  0xbe   :  { %v1001_v40 = vpop.eup %1000  ;;  %v107_v42 = vadd.f32 1.0, %v106_v38  ;;  %v125_v60 = vsub.f32 1.5, %v124_v51 }
  0xbf   :  { %v162_v43 = vmul.f32 %v1001_v40, %v104_v29  ;;  %v156_v44 = vmul.f32 %v997_v28, %v155_v39  ;;  %vm168_vm12 = vweird.f32 %v1001_v40 }
  0xc0   :  { %1002 = vrsqrt.f32 %v107_v42  ;;  %vm169_vm14 = vmor %vm167_vm13, %vm168_vm12  ;;  %v126_v8 = vmul.f32 %v1141_v35, %v125_v60  ;;  %vm177_vm4 = vweird.f32 %v107_v42  ;;  %vm726_vm12 = vcmp.eq.s32.totalorder %v718_v27, 0 }
  0xc1   :  { %v163_v47 = vmul.f32 %v1001_v40, %v162_v43  ;;  %v160_v48 = vsel %vm159_vm10, %v997_v28, %v156_v44  ;;  %1004 = vrsqrt.f32 %v1146_v41  ;;  %v717_v28 = vld [vmem:[%s1481_s2 + $0x20] sm:$0xff]  ;;  %v734_v30 = vsel %vm726_vm12, 1, %v1039_v6 }
  0xc2   :  { %221 = vperm.xlu1 %986, %v160_v48   ;;  %738 = vperm.xlu2 %987, %v729_v45   ;;  %v130_v16 = vsel %vm129_vm5, %v1141_v35, %v126_v8  ;;  %v809_v35 = vsel %vm801_vm2, 1, %v1039_v6  ;;  %vm804_vm5 = vcmp.eq.s32.totalorder %v1153_v49, 1 }
  0xc3   :  { %v164_v50 = vmul.f32 0.5, %v163_v47  ;;  %v812_v38 = vsel %vm804_vm5, 1, %v1039_v6  ;;  %v198_v47 = vld [vmem:[%s1480_s1 + $0x38] sm:$0xff] }
  0xc5   :  { %v165_v52 = vsub.f32 1.5, %v164_v50  ;;  %v108_v53 = vpop.f32.mrf.mxu0 }
  0xc6   :  { %v1003_v54 = vpop.eup %1002  ;;  %v109_v55 = vadd.f32 1.0, %v108_v53 }
  0xc7   :  { %v172_v56 = vmul.f32 %v1003_v54, %v107_v42  ;;  %v166_v57 = vmul.f32 %v1001_v40, %v165_v52  ;;  %v1005_v59 = vpop.eup %1004  ;;  %vm178_vm1 = vweird.f32 %v1003_v54  ;;  %v195_v52 = vld [vmem:[%s1480_s1 + $0x20] sm:$0xff] }
  0xc8   :  { %1006 = vrsqrt.f32 %v109_v55  ;;  %v112_v5 = vmul.f32 %v1005_v59, %v1146_v41  ;;  %vm179_vm6 = vmor %vm177_vm4, %vm178_vm1  ;;  %vm187_vm10 = vweird.f32 %v109_v55  ;;  %vm118_vm13 = vweird.f32 %v1005_v59 }
  0xc9   :  { %v173_v61 = vmul.f32 %v1003_v54, %v172_v56  ;;  %v170_v62 = vsel %vm169_vm14, %v1001_v40, %v166_v57  ;;  %vm805_vm14 = vcmp.eq.s32.totalorder %v717_v28, 1  ;;  %vm119_vm1 = vmor %vm117_vm15, %vm118_vm13  ;;  %vm808_vm4 = vcmp.eq.s32.totalorder %v720_v33, 1  ;;  %v194_v56 = vld [vmem:[%s1480_s1 + $0x18] sm:$0xff] }
  0xca   :  { %226 = vperm.xlu1 %986, %v170_v62   ;;  %747 = vperm.xlu2 %987, %v732_v58   ;;  %v113_v13 = vmul.f32 %v1005_v59, %v112_v5  ;;  %v813_v31 = vsel %vm805_vm14, 1, %v1039_v6  ;;  %v816_v37 = vsel %vm808_vm4, 1, %v1039_v6  ;;  %v811_v41 = vsel %vm803_vm9, 1, %v1039_v6  ;;  %v193_v58 = vld [vmem:[%s1480_s1 + $0x10] sm:$0xff]  ;;  %v191_v62 = vld [vmem:[%s1480_s1] sm:$0xff]  ;;  %v192_v5 = vld [vmem:[%s1480_s1 + $0x8] sm:$0xff] }
  0xcb   :  { %v174_v0 = vmul.f32 0.5, %v173_v61 }
  0xcc   :  { %v114_v20 = vmul.f32 0.5, %v113_v13 }
  0xcd   :  { %v175_v7 = vsub.f32 1.5, %v174_v0 }
  0xce   :  { %v1007_v9 = vpop.eup %1006  ;;  %v115_v25 = vsub.f32 1.5, %v114_v20 }
  0xcf   :  { %v182_v10 = vmul.f32 %v1007_v9, %v109_v55  ;;  %v176_v11 = vmul.f32 %v1003_v54, %v175_v7  ;;  %vm188_vm8 = vweird.f32 %v1007_v9 }
  0xd0   :  { %vm189_vm11 = vmor %vm187_vm10, %vm188_vm8  ;;  %v116_v29 = vmul.f32 %v1005_v59, %v115_v25  ;;  %vm728_vm8 = vcmp.eq.s32.totalorder %v720_v33, 0  ;;  %vm806_vm10 = vcmp.eq.s32.totalorder %v718_v27, 1 }
  0xd1   :  { %v183_v14 = vmul.f32 %v1007_v9, %v182_v10  ;;  %v180_v15 = vsel %vm179_vm6, %v1003_v54, %v176_v11  ;;  %vm725_vm6 = vcmp.eq.s32.totalorder %v717_v28, 0  ;;  %v736_v40 = vsel %vm728_vm8, 1, %v1039_v6  ;;  %v971_v11 = vld [vmem:[%s1482_s3] sm:$0xff] }
  0xd2   :  { %231 = vperm.xlu0 %985, %v180_v15   ;;  %206 = vperm.xlu1 %986, %v130_v16   ;;  %v120_v32 = vsel %vm119_vm1, %v1005_v59, %v116_v29  ;;  %v733_v39 = vsel %vm725_vm6, 1, %v1039_v6  ;;  %v814_v42 = vsel %vm806_vm10, 1, %v1039_v6  ;;  %v196_v6 = vld [vmem:[%s1480_s1 + $0x28] sm:$0xff]  ;;  %vm777_vm10 = vcmask 261120  }
  0xd3   :  { %v184_v19 = vmul.f32 0.5, %v183_v14  ;;  %756 = vperm.xlu2 %987, %v735_v12   ;;  %324 = vmatpush.bf16.msrb.mxu0 %v971_v11 }
  0xd4   :  { %980 = vmatpush.bf16.msra.mxu2 %v971_v11 }
  0xd5   :  { %v185_v21 = vsub.f32 1.5, %v184_v19 }
  0xd7   :  { %v186_v22 = vmul.f32 %v1007_v9, %v185_v21 }
  0xd9   :  { %v190_v26 = vsel %vm189_vm11, %v1007_v9, %v186_v22  ;;  %vm304_vm11 = vcmask 130048  }
  0xda   :  { %236 = vperm.xlu0 %985, %v190_v26   ;;  %744 = vperm.xlu1 %986, %v731_v23  }
  0xdb   :  { %821 = vperm.xlu2 %987, %v810_v24  }
  0xe2   :  { %753 = vperm.xlu1 %986, %v734_v30   ;;  %201 = vperm.xlu0 %985, %v120_v32  }
  0xe3   :  { %830 = vperm.xlu2 %987, %v813_v31  }
  0xea   :  { %818 = vperm.xlu1 %986, %v809_v35   ;;  %741 = vperm.xlu0 %985, %v730_v36  }
  0xeb   :  { %839 = vperm.xlu2 %987, %v816_v37  }
  0xf2   :  { %827 = vperm.xlu1 %986, %v812_v38   ;;  %750 = vperm.xlu0 %985, %v733_v39  }
  0xfa   :  { %836 = vperm.xlu1 %986, %v815_v34   ;;  %759 = vperm.xlu0 %985, %v736_v40  }
 0x102   :  { %824 = vperm.xlu0 %985, %v811_v41  }
 0x10a   :  { %833 = vperm.xlu0 %985, %v814_v42  }
 0x10c   :  { %v1206_v45 = vpop.permute.xlu2 %211 }
 0x10d   :  { %v241_v63 = vmul.f32 %v1206_v45, %v193_v58 }
 0x114   :  { %v1227_v55 = vpop.permute.xlu2 %216 }
 0x115   :  { %v242_v60 = vmul.f32 %v1227_v55, %v194_v56 }
 0x117   :  { %v248_v7 = vpack.c.bf16 %v242_v60, %v241_v63 }
 0x134   :  { %v1202_v43 = vpop.permute.xlu1 %221 }
 0x135   :  { %v243_v57 = vmul.f32 %v1202_v43, %v195_v52  ;;  %v988_v52 = vld [vmem:[%s1483_s4] ss:$0 sm:$0xff]  ;;  %s886_s4 = sshll.u32 %s1490_s11, 4  ;;  %s887_s4 = int_to_ptr.hbm [resolvable:$true] %s886_s4 }
 0x13c   :  { %v1214_v48 = vpop.permute.xlu1 %226 }
 0x13d   :  { %v244_v54 = vmul.f32 %v1214_v48, %v196_v6 }
 0x13f   :  { %v249_v59 = vpack.c.bf16 %v244_v54, %v243_v57 }
 0x144   :  { %v1204_v44 = vpop.permute.xlu0 %231  ;;  %v1243_v0 = vpop.permute.xlu1 %206 }
 0x145   :  { %v245_v50 = vmul.f32 %v1204_v44, %v197_v46  ;;  %v240_v9 = vmul.f32 %v1243_v0, %v192_v5 }
 0x14c   :  { %v1216_v49 = vpop.permute.xlu0 %236 }
 0x14d   :  { %v246_v51 = vmul.f32 %v1216_v49, %v198_v47 }
 0x14f   :  { %v250_v53 = vpack.c.bf16 %v246_v51, %v245_v50 }
 0x151   :  { %255 = vmatpush.bf16.msra.mxu1 %v250_v53 }
 0x154   :  { %v1237_v61 = vpop.permute.xlu0 %201 }
 0x155   :  { %256 = vmatpush.bf16.msra.mxu1 %v249_v59  ;;  %v239_v8 = vmul.f32 %v1237_v61, %v191_v62 }
 0x157   :  { %v247_v10 = vpack.c.bf16 %v240_v9, %v239_v8 }
 0x159   :  { %257 = vmatpush.bf16.msra.mxu1 %v248_v7 }
 0x15d   :  { %258 = vmatpush.bf16.msra.mxu1 %v247_v10 }
 0x160   :  { %915 = vmatmul.msk.bf16.vlgmr.msra.gmra.mxu1 %vm69_vm0, %v1105_v1 }
 0x170   :  { %916 = vmatmul.msk.bf16.gmra.mxu1 %vm69_vm0, %v1112_v2 }
 0x180   :  { %917 = vmatmul.msk.bf16.gmra.mxu1 %vm69_vm0, %v1119_v3 }
 0x190   :  { %918 = vmatmul.msk.bf16.gmra.mxu1 %vm69_vm0, %v1126_v4 }
 0x1dd   :  { %v260_v12 = vpop.f32.mrf.mxu1 }
 0x1de   :  { %v261_v13 = vadd.f32 %v260_v12, %v239_v8 }
 0x1e0   :  { %v280_v16 = vmul.f32 %v261_v13, %v1237_v61  ;;  %v1040_v13 = vmov 1.0  }
 0x1e5   :  { %v262_v14 = vpop.f32.mrf.mxu1 }
 0x1e6   :  { %v263_v15 = vadd.f32 %v262_v14, %v240_v9 }
 0x1e8   :  { %v281_v17 = vmul.f32 %v263_v15, %v1243_v0 }
 0x1ea   :  { %v288_v18 = vpack.c.bf16 %v281_v17, %v280_v16 }
 0x1ec   :  { %923 = vmatmul.msk.bf16.vlgmr.msrb.gmra.mxu0 %vm304_vm11, %v288_v18 }
 0x1ed   :  { %v265_v19 = vpop.f32.mrf.mxu1 }
 0x1ee   :  { %v266_v20 = vadd.f32 %v265_v19, %v241_v63 }
 0x1f0   :  { %v282_v23 = vmul.f32 %v266_v20, %v1206_v45 }
 0x1f5   :  { %v267_v21 = vpop.f32.mrf.mxu1 }
 0x1f6   :  { %v268_v22 = vadd.f32 %v267_v21, %v242_v60 }
 0x1f8   :  { %v283_v24 = vmul.f32 %v268_v22, %v1227_v55 }
 0x1fa   :  { %v289_v25 = vpack.c.bf16 %v283_v24, %v282_v23 }
 0x1fc   :  { %924 = vmatmul.msk.bf16.vlgmr.msra.gmra.mxu2 %vm304_vm11, %v289_v25 }
 0x1fd   :  { %v270_v26 = vpop.f32.mrf.mxu1 }
 0x1fe   :  { %v271_v27 = vadd.f32 %v270_v26, %v243_v57 }
 0x200   :  { %v284_v30 = vmul.f32 %v271_v27, %v1202_v43 }
 0x205   :  { %v272_v28 = vpop.f32.mrf.mxu1 }
 0x206   :  { %v273_v29 = vadd.f32 %v272_v28, %v244_v54 }
 0x208   :  { %v285_v31 = vmul.f32 %v273_v29, %v1214_v48 }
 0x20a   :  { %v290_v32 = vpack.c.bf16 %v285_v31, %v284_v30 }
 0x20c   :  { %925 = vmatmul.msk.bf16.gmra.mxu2 %vm304_vm11, %v290_v32 }
 0x20d   :  { %v275_v33 = vpop.f32.mrf.mxu1 }
 0x20e   :  { %v276_v35 = vadd.f32 %v275_v33, %v245_v50  ;;  %v979_v33 = vld [vmem:[%s1486_s7 + $0x38] sm:$0xff] }
 0x210   :  { %v286_v38 = vmul.f32 %v276_v35, %v1204_v44  ;;  %v978_v35 = vld [vmem:[%s1486_s7 + $0x30] sm:$0xff] }
 0x215   :  { %v277_v36 = vpop.f32.mrf.mxu1 }
 0x216   :  { %v278_v37 = vadd.f32 %v277_v36, %v246_v51  ;;  %v977_v36 = vld [vmem:[%s1486_s7 + $0x28] sm:$0xff] }
 0x218   :  { %v287_v39 = vmul.f32 %v278_v37, %v1216_v49  ;;  %v976_v37 = vld [vmem:[%s1486_s7 + $0x20] sm:$0xff] }
 0x21a   :  { %v291_v34 = vpack.c.bf16 %v287_v39, %v286_v38  ;;  %v975_v38 = vld [vmem:[%s1486_s7 + $0x18] sm:$0xff]  ;;  %v974_v39 = vld [vmem:[%s1486_s7 + $0x10] sm:$0xff] }
 0x21c   :  { %926 = vmatmul.msk.bf16.gmra.mxu2 %vm304_vm11, %v291_v34  ;;  %v973_v34 = vld [vmem:[%s1486_s7 + $0x8] sm:$0xff] }
 0x269   :  { %v326_v6 = vpop.f32.mrf.mxu0 }
 0x26a   :  { %v327_v9 = vadd.f32 %v988_v52, %v326_v6 }
 0x26c   :  { %v348_v12 = vmax.f32 %v327_v9, 0.0 }
 0x271   :  { %v328_v62 = vpop.f32.mrf.mxu0 }
 0x272   :  { %v329_v7 = vadd.f32 %v988_v52, %v328_v62 }
 0x274   :  { %v349_v11 = vmax.f32 %v329_v7, 0.0 }
 0x27f   :  { %v331_v40 = vpop.f32.mrf.mxu2 }
 0x280   :  { %v332_v63 = vadd.f32 %v988_v52, %v331_v40  ;;  %v972_v40 = vld [vmem:[%s1486_s7] sm:$0xff] }
 0x282   :  { %v350_v10 = vmax.f32 %v332_v63, 0.0 }
 0x287   :  { %v333_v41 = vpop.f32.mrf.mxu2 }
 0x288   :  { %v334_v59 = vadd.f32 %v988_v52, %v333_v41 }
 0x28a   :  { %v351_v8 = vmax.f32 %v334_v59, 0.0  ;;  %v989_v59 = vld [vmem:[%s1485_s6] ss:$0 sm:$0xff] }
 0x28f   :  { %v336_v42 = vpop.f32.mrf.mxu2 }
 0x290   :  { %v337_v57 = vadd.f32 %v988_v52, %v336_v42 }
 0x292   :  { %v352_v5 = vmax.f32 %v337_v57, 0.0 }
 0x297   :  { %v338_v46 = vpop.f32.mrf.mxu2 }
 0x298   :  { %v339_v54 = vadd.f32 %v988_v52, %v338_v46 }
 0x29a   :  { %v353_v60 = vmax.f32 %v339_v54, 0.0 }
 0x29f   :  { %v341_v47 = vpop.f32.mrf.mxu2 }
 0x2a0   :  { %v342_v53 = vadd.f32 %v988_v52, %v341_v47 }
 0x2a2   :  { %v354_v58 = vmax.f32 %v342_v53, 0.0 }
 0x2a7   :  { %v343_v50 = vpop.f32.mrf.mxu2 }
 0x2a8   :  { %v344_v51 = vadd.f32 %v988_v52, %v343_v50 }
 0x2aa   :  { %v355_v56 = vmax.f32 %v344_v51, 0.0  ;;  %v346_v51 = vld [vmem:[%s1484_s5] sm:$0x1] }
 0x2ac   :  { %367 = vmatpush.msrb.mxu1 %v355_v56 }
 0x2ae   :  { %368 = vmatpush.msrb.mxu1 %v354_v58 }
 0x2b0   :  { %369 = vmatpush.msrb.mxu1 %v353_v60 }
 0x2b2   :  { %370 = vmatpush.msrb.mxu1 %v352_v5 }
 0x2b4   :  { %371 = vmatpush.msrb.mxu1 %v351_v8 }
 0x2b6   :  { %372 = vmatpush.msrb.mxu1 %v350_v10 }
 0x2b8   :  { %373 = vmatpush.msrb.mxu1 %v349_v11 }
 0x2ba   :  { %374 = vmatpush.msrb.mxu1 %v348_v12 }
 0x2bb   :  { %927 = vmatmul.msk.f32.vlgmr.msrb.gmra.mxu1 %vm69_vm0, %v1040_v13 }
 0x338   :  { %v376_v14 = vpop.f32.mrf.mxu1 }
 0x339   :  { %v379_v15 = vmul.f32 0.015625, %v376_v14 }
 0x33b   :  { %v380_v16 = vperm.slane %v379_v15, 0 }
 0x33d   :  { %v1278_v17 = vsub.f32 %v355_v56, %v380_v16  ;;  %v1280_v18 = vsub.f32 %v354_v58, %v380_v16  ;;  %v1284_v20 = vsub.f32 %v353_v60, %v380_v16  ;;  %v1288_v22 = vsub.f32 %v352_v5, %v380_v16 }
 0x33e   :  { %v384_v24 = vsub.f32 %v351_v8, %v380_v16  ;;  %v383_v26 = vsub.f32 %v350_v10, %v380_v16  ;;  %v382_v28 = vsub.f32 %v349_v11, %v380_v16  ;;  %v381_v30 = vsub.f32 %v348_v12, %v380_v16 }
 0x33f   :  { %v396_v19 = vmul.f32 %v1278_v17, %v1278_v17  ;;  %v395_v21 = vmul.f32 %v1280_v18, %v1280_v18  ;;  %v394_v23 = vmul.f32 %v1284_v20, %v1284_v20  ;;  %v393_v25 = vmul.f32 %v1288_v22, %v1288_v22 }
 0x340   :  { %v392_v27 = vmul.f32 %v384_v24, %v384_v24  ;;  %v391_v29 = vmul.f32 %v383_v26, %v383_v26  ;;  %v390_v31 = vmul.f32 %v382_v28, %v382_v28  ;;  %v389_v32 = vmul.f32 %v381_v30, %v381_v30 }
 0x341   :  { %405 = vmatpush.msra.mxu3 %v396_v19 }
 0x343   :  { %406 = vmatpush.msra.mxu3 %v395_v21 }
 0x345   :  { %407 = vmatpush.msra.mxu3 %v394_v23 }
 0x347   :  { %408 = vmatpush.msra.mxu3 %v393_v25 }
 0x349   :  { %409 = vmatpush.msra.mxu3 %v392_v27 }
 0x34b   :  { %410 = vmatpush.msra.mxu3 %v391_v29 }
 0x34d   :  { %411 = vmatpush.msra.mxu3 %v390_v31 }
 0x34f   :  { %412 = vmatpush.msra.mxu3 %v389_v32 }
 0x350   :  { %928 = vmatmul.msk.f32.vlgmr.msra.gmra.mxu3 %vm69_vm0, %v1040_v13 }
 0x351   :  { %520 = vmatpush.bf16.msrb.mxu3 %v979_v33 }
 0x355   :  { %521 = vmatpush.bf16.msrb.mxu3 %v978_v35 }
 0x359   :  { %522 = vmatpush.bf16.msrb.mxu3 %v977_v36 }
 0x35d   :  { %523 = vmatpush.bf16.msrb.mxu3 %v976_v37 }
 0x361   :  { %524 = vmatpush.bf16.msrb.mxu3 %v975_v38 }
 0x365   :  { %525 = vmatpush.bf16.msrb.mxu3 %v974_v39 }
 0x369   :  { %526 = vmatpush.bf16.msrb.mxu3 %v973_v34 }
 0x36d   :  { %527 = vmatpush.bf16.msrb.mxu3 %v972_v40 }
 0x3d3   :  { %v414_v41 = vpop.f32.mrf.mxu3 }
 0x3d4   :  { %v417_v42 = vmul.f32 0.015625, %v414_v41 }
 0x3d6   :  { %v418_v46 = vadd.f32 1e-05, %v417_v42 }
 0x3d8   :  { %1008 = vrsqrt.f32 %v418_v46  ;;  %vm425_vm13 = vweird.f32 %v418_v46 }
 0x3de   :  { %v1009_v47 = vpop.eup %1008 }
 0x3df   :  { %v420_v6 = vmul.f32 %v1009_v47, %v418_v46  ;;  %vm426_vm12 = vweird.f32 %v1009_v47 }
 0x3e0   :  { %vm427_vm14 = vmor %vm425_vm13, %vm426_vm12 }
 0x3e1   :  { %v421_v52 = vmul.f32 %v1009_v47, %v420_v6 }
 0x3e3   :  { %v422_v50 = vmul.f32 0.5, %v421_v52 }
 0x3e5   :  { %v423_v53 = vsub.f32 1.5, %v422_v50 }
 0x3e7   :  { %v424_v54 = vmul.f32 %v1009_v47, %v423_v53 }
 0x3e9   :  { %v428_v56 = vsel %vm427_vm14, %v1009_v47, %v424_v54 }
 0x3ea   :  { %v429_v57 = vmul.f32 %v428_v56, %v346_v51 }
 0x3ec   :  { %v431_v58 = vperm.slane %v429_v57, 0 }
 0x3ee   :  { %v433_v60 = vmul.f32 %v431_v58, %v381_v30  ;;  %v434_v62 = vmul.f32 %v431_v58, %v382_v28  ;;  %v435_v8 = vmul.f32 %v431_v58, %v383_v26  ;;  %v436_v9 = vmul.f32 %v431_v58, %v384_v24 }
 0x3ef   :  { %v437_v14 = vmul.f32 %v431_v58, %v1288_v22  ;;  %v438_v15 = vmul.f32 %v431_v58, %v1284_v20  ;;  %v439_v23 = vmul.f32 %v431_v58, %v1280_v18  ;;  %v440_v25 = vmul.f32 %v431_v58, %v1278_v17 }
 0x3f0   :  { %v444_v63 = vadd.f32 %v989_v59, %v433_v60  ;;  %v445_v5 = vadd.f32 %v989_v59, %v434_v62  ;;  %v446_v10 = vadd.f32 %v989_v59, %v435_v8  ;;  %v447_v11 = vadd.f32 %v989_v59, %v436_v9 }
 0x3f1   :  { %v448_v16 = vadd.f32 %v989_v59, %v437_v14  ;;  %v449_v19 = vadd.f32 %v989_v59, %v438_v15  ;;  %v450_v27 = vadd.f32 %v989_v59, %v439_v23  ;;  %v451_v28 = vadd.f32 %v989_v59, %v440_v25 }
 0x3f2   :  { %v452_v7 = vpack.c.bf16 %v445_v5, %v444_v63  ;;  %v453_v12 = vpack.c.bf16 %v447_v11, %v446_v10 }
 0x3f3   :  { %v454_v21 = vpack.c.bf16 %v449_v19, %v448_v16  ;;  %v455_v26 = vpack.c.bf16 %v451_v28, %v450_v27 }
 0x3f4   :  { %528 = vmatmul.bf16.vlgmr.msrb.gmra.mxu3 %v452_v7 }
 0x404   :  { %533 = vmatmul.bf16.gmra.mxu3 %v453_v12 }
 0x414   :  { %538 = vmatmul.bf16.gmra.mxu3 %v454_v21 }
 0x424   :  { %543 = vmatmul.bf16.gmra.mxu3 %v455_v26 }
 0x477   :  { %v529_v24 = vpop.f32.mrf.mxu3 }
 0x478   :  { %v549_v42 = vmul.f32 %v529_v24, %v1237_v61 }
 0x47f   :  { %v531_v29 = vpop.f32.mrf.mxu3 }
 0x480   :  { %v550_v40 = vmul.f32 %v531_v29, %v1243_v0 }
 0x482   :  { %v557_v46 = vpack.c.bf16 %v550_v40, %v549_v42 }
 0x487   :  { %v534_v30 = vpop.f32.mrf.mxu3 }
 0x488   :  { %v551_v34 = vmul.f32 %v534_v30, %v1206_v45 }
 0x48f   :  { %v536_v31 = vpop.f32.mrf.mxu3 }
 0x490   :  { %v552_v38 = vmul.f32 %v536_v31, %v1227_v55 }
 0x492   :  { %v558_v41 = vpack.c.bf16 %v552_v38, %v551_v34 }
 0x497   :  { %v539_v32 = vpop.f32.mrf.mxu3 }
 0x498   :  { %v553_v17 = vmul.f32 %v539_v32, %v1202_v43 }
 0x49f   :  { %v541_v22 = vpop.f32.mrf.mxu3 }
 0x4a0   :  { %v554_v18 = vmul.f32 %v541_v22, %v1214_v48 }
 0x4a2   :  { %v559_v39 = vpack.c.bf16 %v554_v18, %v553_v17 }
 0x4a7   :  { %v544_v33 = vpop.f32.mrf.mxu3 }
 0x4a8   :  { %v555_v35 = vmul.f32 %v544_v33, %v1204_v44 }
 0x4af   :  { %v546_v20 = vpop.f32.mrf.mxu3 }
 0x4b0   :  { %v556_v36 = vmul.f32 %v546_v20, %v1216_v49 }
 0x4b2   :  { %v560_v37 = vpack.c.bf16 %v556_v36, %v555_v35 }
 0x4b4   :  { %565 = vmatpush.bf16.msrb.mxu2 %v560_v37 }
 0x4b8   :  { %566 = vmatpush.bf16.msrb.mxu2 %v559_v39 }
 0x4bc   :  { %567 = vmatpush.bf16.msrb.mxu2 %v558_v41  ;;  %v1381_v41 = vpop.permute.xlu2 %738 }
 0x4bd   :  { %vm761_vm2 = vcmp.eq.s32.totalorder %v1381_v41, 1 }
 0x4c0   :  { %568 = vmatpush.bf16.msrb.mxu2 %v557_v46 }
 0x4c3   :  { %961 = vmatmul.msk.bf16.vlgmr.msrb.gmra.mxu2 %vm69_vm0, %v1105_v1 }
 0x4c4   :  { %v1385_v46 = vpop.permute.xlu2 %747 }
 0x4c5   :  { %vm764_vm3 = vcmp.eq.s32.totalorder %v1385_v46, 1 }
 0x4d3   :  { %962 = vmatmul.msk.bf16.gmra.mxu2 %vm69_vm0, %v1112_v2 }
 0x4e3   :  { %963 = vmatmul.msk.bf16.gmra.mxu2 %vm69_vm0, %v1119_v3 }
 0x4f3   :  { %964 = vmatmul.msk.bf16.gmra.mxu2 %vm69_vm0, %v1126_v4  ;;  %v990_v4 = vld [vmem:[%s1487_s8] ss:$0 sm:$0xff] }
 0x546   :  { %v570_v47 = vpop.f32.mrf.mxu2 }
 0x547   :  { %v571_v12 = vadd.f32 %v570_v47, %v549_v42  ;;  %v1383_v42 = vpop.permute.xlu0 %741  ;;  %v1387_v47 = vpop.permute.xlu1 %744 }
 0x548   :  { %vm763_vm5 = vcmp.eq.s32.totalorder %v1387_v47, 1  ;;  %vm762_vm7 = vcmp.eq.s32.totalorder %v1383_v42, 1 }
 0x54e   :  { %v572_v6 = vpop.f32.mrf.mxu2 }
 0x54f   :  { %v573_v9 = vadd.f32 %v572_v6, %v550_v40  ;;  %v1389_v6 = vpop.permute.xlu0 %750 }
 0x550   :  { %vm765_vm8 = vcmp.eq.s32.totalorder %v1389_v6, 1 }
 0x551   :  { %v591_v15 = vmul.f32 %v573_v9, %v1243_v0 }
 0x553   :  { %v603_v25 = vadd.f32 %v990_v4, %v591_v15 }
 0x556   :  { %v575_v52 = vpop.f32.mrf.mxu2 }
 0x557   :  { %v576_v63 = vadd.f32 %v575_v52, %v551_v34  ;;  %v1391_v52 = vpop.permute.xlu2 %756 }
 0x558   :  { %vm767_vm4 = vcmp.eq.s32.totalorder %v1391_v52, 1 }
 0x559   :  { %v592_v14 = vmul.f32 %v576_v63, %v1206_v45  ;;  %v613_v45 = vmax.f32 %v603_v25, 0.0  ;;  %v610_v63 = vld [vmem:[%s1488_s9] sm:$0x1]  ;;  %s1041_s9 = smov [#allocation2]  }
 0x55b   :  { %v604_v23 = vadd.f32 %v990_v4, %v592_v14 }
 0x55d   :  { %v614_v27 = vmax.f32 %v604_v23, 0.0 }
 0x55e   :  { %v577_v50 = vpop.f32.mrf.mxu2 }
 0x55f   :  { %v578_v60 = vadd.f32 %v577_v50, %v552_v38  ;;  %v1393_v50 = vpop.permute.xlu1 %753 }
 0x560   :  { %vm766_vm6 = vcmp.eq.s32.totalorder %v1393_v50, 1 }
 0x561   :  { %v593_v10 = vmul.f32 %v578_v60, %v1227_v55 }
 0x563   :  { %v605_v19 = vadd.f32 %v990_v4, %v593_v10 }
 0x565   :  { %v615_v55 = vmax.f32 %v605_v19, 0.0 }
 0x566   :  { %v580_v53 = vpop.f32.mrf.mxu2 }
 0x567   :  { %v581_v1 = vadd.f32 %v580_v53, %v553_v17 }
 0x569   :  { %v594_v5 = vmul.f32 %v581_v1, %v1202_v43  ;;  %v590_v43 = vmul.f32 %v571_v12, %v1237_v61 }
 0x56b   :  { %v602_v28 = vadd.f32 %v990_v4, %v590_v43 }
 0x56d   :  { %v612_v26 = vmax.f32 %v602_v28, 0.0 }
 0x56e   :  { %v582_v51 = vpop.f32.mrf.mxu2 }
 0x56f   :  { %v583_v57 = vadd.f32 %v582_v51, %v554_v18 }
 0x571   :  { %v595_v3 = vmul.f32 %v583_v57, %v1214_v48  ;;  %v1399_v57 = vpop.permute.xlu1 %818 }
 0x572   :  { %vm841_vm12 = vcmp.eq.s32.totalorder %v1399_v57, 1 }
 0x576   :  { %v585_v54 = vpop.f32.mrf.mxu2 }
 0x577   :  { %v586_v56 = vadd.f32 %v585_v54, %v555_v35 }
 0x579   :  { %v596_v59 = vmul.f32 %v586_v56, %v1204_v44  ;;  %v607_v44 = vadd.f32 %v990_v4, %v595_v3  ;;  %v1395_v56 = vpop.permute.xlu0 %759  ;;  %v1405_v3 = vpop.permute.xlu1 %827 }
 0x57a   :  { %vm768_vm9 = vcmp.eq.s32.totalorder %v1395_v56, 1 }
 0x57b   :  { %v608_v8 = vadd.f32 %v990_v4, %v596_v59  ;;  %v617_v16 = vmax.f32 %v607_v44, 0.0 }
 0x57d   :  { %v618_v48 = vmax.f32 %v608_v8, 0.0 }
 0x57e   :  { %v587_v58 = vpop.f32.mrf.mxu2 }
 0x57f   :  { %v588_v2 = vadd.f32 %v587_v58, %v556_v36 }
 0x581   :  { %v597_v62 = vmul.f32 %v588_v2, %v1216_v49  ;;  %v606_v49 = vadd.f32 %v990_v4, %v594_v5  ;;  %v1401_v2 = vpop.permute.xlu0 %824  ;;  %v837_v12 = vpop.permute.xlu1 %836 }
 0x582   :  { %vm843_vm14 = vcmp.eq.s32.totalorder %v1401_v2, 1  ;;  %vm847_vm13 = vcmp.eq.s32.totalorder %v837_v12, 1 }
 0x583   :  { %v609_v7 = vadd.f32 %v990_v4, %v597_v62  ;;  %v616_v21 = vmax.f32 %v606_v49, 0.0 }
 0x585   :  { %v619_v11 = vmax.f32 %v609_v7, 0.0 }
 0x587   :  { %628 = vmatpush.msra.mxu0 %v619_v11 }
 0x589   :  { %629 = vmatpush.msra.mxu0 %v618_v48  ;;  %v834_v9 = vpop.permute.xlu0 %833 }
 0x58b   :  { %630 = vmatpush.msra.mxu0 %v617_v16 }
 0x58d   :  { %631 = vmatpush.msra.mxu0 %v616_v21 }
 0x58f   :  { %632 = vmatpush.msra.mxu0 %v615_v55 }
 0x591   :  { %633 = vmatpush.msra.mxu0 %v614_v27 }
 0x593   :  { %634 = vmatpush.msra.mxu0 %v613_v45 }
 0x595   :  { %635 = vmatpush.msra.mxu0 %v612_v26 }
 0x596   :  { %965 = vmatmul.msk.f32.vlgmr.msra.gmra.mxu0 %vm69_vm0, %v1040_v13 }
 0x613   :  { %v637_v0 = vpop.f32.mrf.mxu0 }
 0x614   :  { %v640_v24 = vmul.f32 0.015625, %v637_v0 }
 0x616   :  { %v641_v61 = vperm.slane %v640_v24, 0 }
 0x618   :  { %v1359_v29 = vsub.f32 %v619_v11, %v641_v61  ;;  %v1361_v30 = vsub.f32 %v618_v48, %v641_v61  ;;  %v1365_v32 = vsub.f32 %v617_v16, %v641_v61  ;;  %v1369_v33 = vsub.f32 %v616_v21, %v641_v61  ;;  %v991_v11 = vld [vmem:[%s1489_s10] ss:$0 sm:$0xff]  ;;  %s884_s10 = sshll.u32 %s1041_s9, 4  ;;  %s885_s10 = int_to_ptr.vmem [resolvable:$true] %s884_s10 }
 0x619   :  { %v1373_v35 = vsub.f32 %v615_v55, %v641_v61  ;;  %v644_v18 = vsub.f32 %v614_v27, %v641_v61  ;;  %v643_v17 = vsub.f32 %v613_v45, %v641_v61  ;;  %v642_v39 = vsub.f32 %v612_v26, %v641_v61 }
 0x61a   :  { %v657_v31 = vmul.f32 %v1359_v29, %v1359_v29  ;;  %v656_v22 = vmul.f32 %v1361_v30, %v1361_v30  ;;  %v655_v20 = vmul.f32 %v1365_v32, %v1365_v32  ;;  %v654_v36 = vmul.f32 %v1369_v33, %v1369_v33 }
 0x61b   :  { %v653_v37 = vmul.f32 %v1373_v35, %v1373_v35  ;;  %v652_v38 = vmul.f32 %v644_v18, %v644_v18  ;;  %v651_v34 = vmul.f32 %v643_v17, %v643_v17  ;;  %v650_v40 = vmul.f32 %v642_v39, %v642_v39 }
 0x61c   :  { %666 = vmatpush.msra.mxu1 %v657_v31 }
 0x61e   :  { %667 = vmatpush.msra.mxu1 %v656_v22 }
 0x620   :  { %668 = vmatpush.msra.mxu1 %v655_v20 }
 0x622   :  { %669 = vmatpush.msra.mxu1 %v654_v36 }
 0x624   :  { %670 = vmatpush.msra.mxu1 %v653_v37 }
 0x626   :  { %671 = vmatpush.msra.mxu1 %v652_v38 }
 0x628   :  { %672 = vmatpush.msra.mxu1 %v651_v34 }
 0x62a   :  { %673 = vmatpush.msra.mxu1 %v650_v40 }
 0x62b   :  { %966 = vmatmul.msk.f32.vlgmr.msra.gmra.mxu1 %vm69_vm0, %v1040_v13  ;;  %v1397_v13 = vpop.permute.xlu2 %821 }
 0x62c   :  { %vm842_vm11 = vcmp.eq.s32.totalorder %v1397_v13, 1 }
 0x633   :  { %v1403_v60 = vpop.permute.xlu2 %830 }
 0x63b   :  { %v840_v44 = vpop.permute.xlu2 %839 }
 0x6a8   :  { %v675_v53 = vpop.f32.mrf.mxu1 }
 0x6a9   :  { %v678_v51 = vmul.f32 0.015625, %v675_v53 }
 0x6ab   :  { %v679_v54 = vadd.f32 1e-05, %v678_v51 }
 0x6ad   :  { %1010 = vrsqrt.f32 %v679_v54  ;;  %vm686_vm15 = vweird.f32 %v679_v54 }
 0x6b3   :  { %v1011_v58 = vpop.eup %1010 }
 0x6b4   :  { %v681_v1 = vmul.f32 %v1011_v58, %v679_v54  ;;  %vm687_vm0 = vweird.f32 %v1011_v58 }
 0x6b5   :  { %vm688_vm1 = vmor %vm686_vm15, %vm687_vm0  ;;  %vm845_vm0 = vcmp.eq.s32.totalorder %v1403_v60, 1  ;;  %vm846_vm15 = vcmp.eq.s32.totalorder %v834_v9, 1 }
 0x6b6   :  { %v682_v59 = vmul.f32 %v1011_v58, %v681_v1 }
 0x6b8   :  { %v683_v62 = vmul.f32 0.5, %v682_v59 }
 0x6ba   :  { %v684_v4 = vsub.f32 1.5, %v683_v62 }
 0x6bc   :  { %v685_v5 = vmul.f32 %v1011_v58, %v684_v4 }
 0x6be   :  { %v689_v7 = vsel %vm688_vm1, %v1011_v58, %v685_v5  ;;  %vm848_vm1 = vcmp.eq.s32.totalorder %v840_v44, 1 }
 0x6bf   :  { %v690_v8 = vmul.f32 %v689_v7, %v610_v63 }
 0x6c1   :  { %v692_v10 = vperm.slane %v690_v8, 0 }
 0x6c3   :  { %v694_v14 = vmul.f32 %v692_v10, %v642_v39  ;;  %v695_v48 = vmul.f32 %v692_v10, %v643_v17  ;;  %v696_v49 = vmul.f32 %v692_v10, %v644_v18  ;;  %v697_v15 = vmul.f32 %v692_v10, %v1373_v35 }
 0x6c4   :  { %v698_v16 = vmul.f32 %v692_v10, %v1369_v33  ;;  %v699_v19 = vmul.f32 %v692_v10, %v1365_v32  ;;  %v700_v43 = vmul.f32 %v692_v10, %v1361_v30  ;;  %v701_v21 = vmul.f32 %v692_v10, %v1359_v29 }
 0x6c5   :  { %v705_v23 = vadd.f32 %v991_v11, %v694_v14  ;;  %v706_v55 = vadd.f32 %v991_v11, %v695_v48  ;;  %v707_v25 = vadd.f32 %v991_v11, %v696_v49  ;;  %v708_v27 = vadd.f32 %v991_v11, %v697_v15 }
 0x6c6   :  { %v709_v28 = vadd.f32 %v991_v11, %v698_v16  ;;  %v710_v45 = vadd.f32 %v991_v11, %v699_v19  ;;  %v711_v26 = vadd.f32 %v991_v11, %v700_v43  ;;  %v712_v0 = vadd.f32 %v991_v11, %v701_v21 }
 0x6c7   :  { %v769_v24 = vsel %vm761_vm2, %v705_v23, -inf  ;;  %v770_v61 = vsel %vm762_vm7, %v706_v55, -inf  ;;  %v771_v30 = vsel %vm763_vm5, %v707_v25, -inf  ;;  %v772_v29 = vsel %vm764_vm3, %v708_v27, -inf }
 0x6c8   :  { %v773_v31 = vsel %vm765_vm8, %v709_v28, -inf  ;;  %v774_v32 = vsel %vm766_vm6, %v710_v45, -inf  ;;  %v775_v22 = vsel %vm767_vm4, %v711_v26, -inf  ;;  %v776_v33 = vsel %vm768_vm9, %v712_v0, -inf }
 0x6c9   :  { %v778_v20 = vsel %vm777_vm10, %v769_v24, -inf  ;;  %v779_v35 = vsel %vm777_vm10, %v770_v61, -inf  ;;  %v780_v36 = vsel %vm777_vm10, %v771_v30, -inf  ;;  %v781_v18 = vsel %vm777_vm10, %v772_v29, -inf }
 0x6ca   :  { %v782_v37 = vsel %vm777_vm10, %v773_v31, -inf  ;;  %v784_v17 = vsel %vm777_vm10, %v774_v32, -inf  ;;  %v786_v38 = vsel %vm777_vm10, %v775_v22, -inf  ;;  %v788_v39 = vsel %vm777_vm10, %v776_v33, -inf }
 0x6cb   :  { %v783_v34 = vmax.f32 %v778_v20, %v782_v37  ;;  %v785_v40 = vmax.f32 %v779_v35, %v784_v17  ;;  %v787_v41 = vmax.f32 %v780_v36, %v786_v38  ;;  %v789_v42 = vmax.f32 %v781_v18, %v788_v39 }
 0x6cc   :  { %v849_v46 = vsel %vm841_vm12, %v705_v23, -inf  ;;  %v850_v47 = vsel %vm842_vm11, %v706_v55, -inf  ;;  %v851_v6 = vsel %vm843_vm14, %v707_v25, -inf  ;;  %vm1491_vm2 = vcmp.eq.s32.totalorder %v1405_v3, 1 }
 0x6cd   :  { %v852_v52 = vsel %vm1491_vm2, %v708_v27, -inf  ;;  %v790_v50 = vmax.f32 %v783_v34, %v785_v40  ;;  %v791_v53 = vmax.f32 %v787_v41, %v789_v42  ;;  %v853_v51 = vsel %vm845_vm0, %v709_v28, -inf }
 0x6ce   :  { %v854_v54 = vsel %vm846_vm15, %v710_v45, -inf  ;;  %v855_v56 = vsel %vm847_vm13, %v711_v26, -inf  ;;  %v856_v57 = vsel %vm848_vm1, %v712_v0, -inf  ;;  %v857_v13 = vsel %vm777_vm10, %v849_v46, -inf }
 0x6cf   :  { %v858_v58 = vsel %vm777_vm10, %v850_v47, -inf  ;;  %v792_v1 = vmax.f32 %v790_v50, %v791_v53  ;;  %v859_v59 = vsel %vm777_vm10, %v851_v6, -inf  ;;  %v860_v2 = vsel %vm777_vm10, %v852_v52, -inf }
 0x6d0   :  { %v861_v3 = vsel %vm777_vm10, %v853_v51, -inf  ;;  %v863_v60 = vsel %vm777_vm10, %v854_v54, -inf  ;;  %v865_v4 = vsel %vm777_vm10, %v855_v56, -inf  ;;  %v867_v63 = vsel %vm777_vm10, %v856_v57, -inf }
 0x6d1   :  { %v862_v62 = vmax.f32 %v857_v13, %v861_v3  ;;  %v793_v5 = vrot.slane %v792_v1, 4  ;;  %v864_v7 = vmax.f32 %v858_v58, %v863_v60  ;;  %v866_v8 = vmax.f32 %v859_v59, %v865_v4 }
 0x6d2   :  { %v868_v9 = vmax.f32 %v860_v2, %v867_v63  ;;  %vm799_vm3 = vcmask 253952  }
 0x6d3   :  { %v794_v10 = vmax.f32 %v792_v1, %v793_v5  ;;  %v869_v11 = vmax.f32 %v862_v62, %v864_v7 }
 0x6d4   :  { %v870_v44 = vmax.f32 %v866_v8, %v868_v9 }
 0x6d5   :  { %v795_v12 = vrot.slane %v794_v10, 2 }
 0x6d6   :  { %v871_v14 = vmax.f32 %v869_v11, %v870_v44 }
 0x6d7   :  { %v796_v48 = vmax.f32 %v794_v10, %v795_v12 }
 0x6d8   :  { %v872_v49 = vrot.slane %v871_v14, 4 }
 0x6d9   :  { %v797_v15 = vrot.slane %v796_v48, 1 }
 0x6da   :  { %v873_v16 = vmax.f32 %v871_v14, %v872_v49 }
 0x6db   :  { %v798_v19 = vmax.f32 %v796_v48, %v797_v15 }
 0x6dc   :  { %v874_v43 = vrot.slane %v873_v16, 2 }
 0x6dd   :  { %800 = vst.msk [vmem:[#allocation2] sm:$0x1] %vm799_vm3, %v798_v19 }
 0x6de   :  { %v875_v21 = vmax.f32 %v873_v16, %v874_v43 }
 0x6e0   :  { %v876_v23 = vrot.slane %v875_v21, 1 }
 0x6e2   :  { %v877_v55 = vmax.f32 %v875_v21, %v876_v23 }
 0x6e4   :  { %878 = vst.msk [vmem:[#allocation2 + $0x1] sm:$0x1] %vm799_vm3, %v877_v55 }
 0x6e5   :  { %889 = dma.vmem_to_hbm [thread:$0]  %s885_s10, 32, %s887_s4, [#allocation3]  }
 0x6e6   :  { %1036 = dma.done.wait [#allocation3], 32  }
 0x6e7   :  { %1037 = vsyncadd [#allocation3], 4294967264 }
 0x6e8   :  { %894 = vsyncpa [#allocation3], 1 }

</bundles_post_ra>
